<compile_context>
chip_gen: v7x
topology: tpu7x:2x2x1
jax: 0.10.0
libtpu: 0.0.40
codegen_flags: <defaults>
</compile_context>

<pallas_src>
import functools

import jax
import jax.numpy as jnp
from jax.experimental import pallas as pl
from jax.experimental.pallas import tpu as pltpu


def _dma_flatten_kernel(x_ref, o_ref, sem, *, n_chunks, rows_per_chunk):
    """Pure DMA-engine HBM->HBM copy of an (n, flat) buffer.

    `x_ref` / `o_ref` are raw HBM refs (memory_space=pl.ANY); `sem` is a
    (n_chunks,) DMA-semaphore array.  All chunk DMAs are started first (so
    they are concurrently in flight on the DMA engines), then waited on.
    """
    copies = []
    for i in range(n_chunks):  # static Python loop: n_chunks is a trace-time const
        r0 = i * rows_per_chunk
        cp = pltpu.make_async_copy(
            x_ref.at[pl.ds(r0, rows_per_chunk)],
            o_ref.at[pl.ds(r0, rows_per_chunk)],
            sem.at[i],
        )
        cp.start()
        copies.append(cp)
    for cp in copies:
        cp.wait()


def _pick_num_chunks(n_rows, row_bytes):
    """Small static chunk count: only split when each chunk stays >= ~4 MiB."""
    target_chunk_bytes = 4 << 20
    for c in (8, 4, 2):
        if n_rows % c == 0 and (n_rows // c) * row_bytes >= target_chunk_bytes:
            return c
    return 1


def flatten(feat: jax.Array) -> jax.Array:
    """Pallas equivalent of feat.view(feat.size(0), -1)."""
    n = feat.shape[0]
    flat = 1
    for d in feat.shape[1:]:
        flat *= d

    # Contiguous flatten: free metadata change. The kernel only ever sees a
    # (n, flat) buffer, and the DMA copies raw bytes (dtype-agnostic).
    x2 = feat.reshape(n, flat)

    if n == 0 or flat == 0:
        # Degenerate empty tensor: nothing to copy.
        return x2

    # TODO(synk): PyTorch's .view aliases storage (zero-copy); a functional
    # pallas_call must materialize an output buffer, so one HBM->HBM copy
    # remains (the minimum possible given a mandated kernel).
    itemsize = jnp.dtype(feat.dtype).itemsize
    n_chunks = _pick_num_chunks(n, flat * itemsize)
    rows_per_chunk = n // n_chunks

    kernel = functools.partial(
        _dma_flatten_kernel, n_chunks=n_chunks, rows_per_chunk=rows_per_chunk
    )

    return pl.pallas_call(
        kernel,
        out_shape=jax.ShapeDtypeStruct((n, flat), feat.dtype),
        in_specs=[pl.BlockSpec(memory_space=pl.ANY)],   # stay in HBM, no auto-DMA
        out_specs=pl.BlockSpec(memory_space=pl.ANY),    # output allocated in HBM
        scratch_shapes=[pltpu.SemaphoreType.DMA((n_chunks,))],
    )(x2)


if __name__ == "__main__":
    key = jax.random.PRNGKey(0)
    # Small NCHW input consistent with a conv feature map feeding Flatten.
    x = jax.random.normal(key, (2, 4, 16, 16), dtype=jnp.float32)

    out = flatten(x)
    out = jax.block_until_ready(out)

    # Reference: plain JAX reshape (same semantics as torch .view on a
    # contiguous tensor).
    ref = x.reshape(x.shape[0], -1)

    assert out.shape == (2, 4 * 16 * 16), out.shape
    assert out.dtype == x.dtype
    assert bool(jnp.array_equal(out, ref))

    print("KERNEL_OK")
</pallas_src>

<mosaic_0001>
module attributes {stable_mosaic.version = 11 : i64} {
  func.func @_dma_flatten_kernel(%arg0: memref<2x1024xf32, #tpu.memory_space<any>>, %arg1: memref<2x1024xf32, #tpu.memory_space<any>>, %arg2: memref<1x!tpu.dma_semaphore, #tpu.memory_space<semaphore_mem>>) attributes {dimension_semantics = [], scalar_prefetch = 0 : i64, scratch_operands = 1 : i64, tpu.core_type = #tpu.core_type<tc>} {
    %c0_i32 = arith.constant 0 : i32
    %c0_i32_0 = arith.constant 0 : i32
    %c0_i32_1 = arith.constant 0 : i32
    %0 = tpu.memref_slice %arg0[%c0_i32_0, %c0_i32_1] : memref<2x1024xf32, #tpu.memory_space<any>> -> memref<2x1024xf32, #tpu.memory_space<any>>
    %c0_i32_2 = arith.constant 0 : i32
    %c0_i32_3 = arith.constant 0 : i32
    %1 = tpu.memref_slice %arg1[%c0_i32_2, %c0_i32_3] : memref<2x1024xf32, #tpu.memory_space<any>> -> memref<2x1024xf32, #tpu.memory_space<any>>
    %2 = tpu.memref_slice %arg2[%c0_i32] : memref<1x!tpu.dma_semaphore, #tpu.memory_space<semaphore_mem>> -> memref<1x!tpu.dma_semaphore, #tpu.memory_space<semaphore_mem>>
    %3 = tpu.memref_squeeze %2 : memref<1x!tpu.dma_semaphore, #tpu.memory_space<semaphore_mem>> -> memref<!tpu.dma_semaphore, #tpu.memory_space<semaphore_mem>>
    tpu.enqueue_dma source(%0 : memref<2x1024xf32, #tpu.memory_space<any>>) target(%1 : memref<2x1024xf32, #tpu.memory_space<any>>) target_semaphore(%3 : memref<!tpu.dma_semaphore, #tpu.memory_space<semaphore_mem>>)
    %c0_i32_4 = arith.constant 0 : i32
    %c0_i32_5 = arith.constant 0 : i32
    %c0_i32_6 = arith.constant 0 : i32
    %4 = tpu.memref_slice %arg0[%c0_i32_5, %c0_i32_6] : memref<2x1024xf32, #tpu.memory_space<any>> -> memref<2x1024xf32, #tpu.memory_space<any>>
    %c0_i32_7 = arith.constant 0 : i32
    %c0_i32_8 = arith.constant 0 : i32
    %5 = tpu.memref_slice %arg1[%c0_i32_7, %c0_i32_8] : memref<2x1024xf32, #tpu.memory_space<any>> -> memref<2x1024xf32, #tpu.memory_space<any>>
    %6 = tpu.memref_slice %arg2[%c0_i32_4] : memref<1x!tpu.dma_semaphore, #tpu.memory_space<semaphore_mem>> -> memref<1x!tpu.dma_semaphore, #tpu.memory_space<semaphore_mem>>
    %7 = tpu.memref_squeeze %6 : memref<1x!tpu.dma_semaphore, #tpu.memory_space<semaphore_mem>> -> memref<!tpu.dma_semaphore, #tpu.memory_space<semaphore_mem>>
    tpu.wait_dma2 semaphore(%7 : memref<!tpu.dma_semaphore, #tpu.memory_space<semaphore_mem>>) src(%4 : memref<2x1024xf32, #tpu.memory_space<any>>) dst(%5 : memref<2x1024xf32, #tpu.memory_space<any>>)
    return
  }
}

</mosaic_0001>

<bundles_post_ra>
// kernel: tpu_custom_call.1
= control target key start
LH: loop header
LB: loop body
LE: loop exit
PB: predicated region body
PF: predicated region fallthrough
CT: control target
= control target key end

     0   :  { %s35_s6 = smov [#allocation2]   ;;  %s36_s7 = smov [#allocation3]   ;;  %s54_s0 = inlined_call_operand.hbm [shape: f32[2,1024], index: 0, kind: input, shape index: {}]   ;;  %s55_s1 = inlined_call_operand.hbm [shape: f32[2,1024], index: 1, kind: output, shape index: {}]  }
   0x1   :  { %s37_s8 = smov 0  }
   0x2   :  { %18 = dma.general %s54_s0, 256, %s55_s1, %s35_s6, %s36_s7, [#allocation4], %s37_s8, 0  }
   0x3   :  { %33 = dma.done.wait [#allocation2], 256 }
   0x4   :  { %34 = vsyncadd [#allocation2], 4294967040 }
   0x5   :  { %23 = vsyncmov [#allocation2] }
   0x8   :  { %s24_s13 = vpop.sfrf %23 }
   0x9   :  { %p29_p0 = scmp.ne.s32.totalorder %s24_s13, 0 }
   0xb   :  { %28 = shalt.err (%p29_p0)  }

</bundles_post_ra>
